<compile_context>
chip_gen: v7x
topology: tpu7x:2x2x1
jax: 0.10.0
libtpu: 0.0.40
codegen_flags: <defaults>
</compile_context>

<pallas_src>
import jax
import jax.numpy as jnp
from jax.experimental import pallas as pl
from jax.experimental.pallas import tpu as pltpu

_NEG_BIG = -1e30  # bias for padded logit lanes; exp underflows to exactly 0


def _round_up(x, m):
    return ((x + m - 1) // m) * m


def _classifier_kernel(z_ref,
                       w1_ref, b1_ref,
                       w2_ref, b2_ref,
                       w34_ref, b34_ref,
                       out_ref):
    """Fused 3-matmul MLP + softmax for one batch tile (weights VMEM-resident)."""
    x = z_ref[...]                                     # f32, no wrapper cast
    # Weights arrive as bf16 (half the DMA bytes) and are upcast once per tile
    # on the VPU; all math below is f32.
    w1 = w1_ref[...].astype(jnp.float32)
    w2 = w2_ref[...].astype(jnp.float32)
    w34 = w34_ref[...].astype(jnp.float32)

    h = jnp.dot(x, w1, preferred_element_type=jnp.float32) + b1_ref[...]
    h = jnp.maximum(h, 0.0)
    h = jnp.dot(h, w2, preferred_element_type=jnp.float32) + b2_ref[...]
    h = jnp.maximum(h, 0.0)
    # Hidden layer 3 (no ReLU) and the output layer are pre-fused into w34/b34.
    logits = jnp.dot(h, w34, preferred_element_type=jnp.float32) + b34_ref[...]

    m = jnp.max(logits, axis=-1, keepdims=True)
    e = jnp.exp(logits - m)                            # padded lanes -> exactly 0
    denom = jnp.sum(e, axis=-1, keepdims=True)
    probs = e / denom                                  # exact normalization
    # Lane-dense compute, narrow writeback: store only the real classes.
    out_ref[...] = probs[:, :out_ref.shape[-1]].astype(out_ref.dtype)


def prepare_params(params, weight_dtype=jnp.bfloat16):
    """One-time weight prep; keep the result and reuse it for every forward call.

    params: list of (W_t, b) with W_t shaped (in_features, out_features),
            in order [h[0], h[1], h[2], output].
    """
    (w1, b1), (w2, b2), (w3, b3), (wo, bo) = params
    z_dim, h1 = w1.shape
    h2 = w2.shape[1]
    n_class = wo.shape[1]

    # Exact fusion of the last hidden layer and the output layer (no ReLU between).
    w34 = w3.astype(jnp.float32) @ wo.astype(jnp.float32)                 # (h2, n_class)
    b34 = (b3.astype(jnp.float32).reshape(1, -1) @ wo.astype(jnp.float32)
           + bo.astype(jnp.float32).reshape(1, -1))                       # (1, n_class)

    # 128-lane padding of hidden widths (exact) and of the fused logits (-1e30 bias).
    h1p = _round_up(h1, 128)
    h2p = _round_up(h2, 128)
    ncp = _round_up(n_class, 128)

    w1p = jnp.zeros((z_dim, h1p), jnp.float32).at[:, :h1].set(w1)
    b1p = jnp.zeros((1, h1p), jnp.float32).at[:, :h1].set(b1.reshape(1, h1))
    w2p = jnp.zeros((h1p, h2p), jnp.float32).at[:h1, :h2].set(w2)
    b2p = jnp.zeros((1, h2p), jnp.float32).at[:, :h2].set(b2.reshape(1, h2))
    w34p = jnp.zeros((h2p, ncp), jnp.float32).at[:h2, :n_class].set(w34)
    b34p = jnp.full((1, ncp), _NEG_BIG, jnp.float32).at[:, :n_class].set(b34)

    return dict(
        w1=w1p.astype(weight_dtype), b1=b1p,
        w2=w2p.astype(weight_dtype), b2=b2p,
        w34=w34p.astype(weight_dtype), b34=b34p,   # biases stay f32 (keep -1e30 exact)
        n_class=int(n_class),
    )


def classifier_forward(z, prepped, *, b_tile=512):
    """Forward pass; `prepped` is the output of prepare_params()."""
    B, z_dim = z.shape
    n_class = prepped["n_class"]

    # Batch tiling: once B >= 16 make the grid have >=2 steps so v7x can shard
    # the "parallel" batch axis across both TensorCores; cap at b_tile.
    if B >= 16:
        bt = max(8, min(b_tile, _round_up(pl.cdiv(B, 2), 8)))
    else:
        bt = _round_up(max(B, 1), 8)
    b_padded = _round_up(B, bt)
    zp = z if b_padded == B else jnp.pad(z, ((0, b_padded - B), (0, 0)))
    grid = (b_padded // bt,)

    def const(arr):  # weights/biases: same block every step -> stay VMEM-resident
        return pl.BlockSpec(arr.shape, lambda i: (0, 0))

    out = pl.pallas_call(
        _classifier_kernel,
        out_shape=jax.ShapeDtypeStruct((b_padded, n_class), jnp.float32),
        grid=grid,
        in_specs=[pl.BlockSpec((bt, z_dim), lambda i: (i, 0)),
                  const(prepped["w1"]), const(prepped["b1"]),
                  const(prepped["w2"]), const(prepped["b2"]),
                  const(prepped["w34"]), const(prepped["b34"])],
        out_specs=pl.BlockSpec((bt, n_class), lambda i: (i, 0)),
        compiler_params=pltpu.CompilerParams(
            dimension_semantics=("parallel",)),
    )(zp, prepped["w1"], prepped["b1"], prepped["w2"], prepped["b2"],
      prepped["w34"], prepped["b34"])

    return out if b_padded == B else out[:B]


def _reference(z, params):
    """Pure-JAX f32 reference matching the PyTorch forward."""
    (w1, b1), (w2, b2), (w3, b3), (wo, bo) = params
    h = jnp.maximum(z @ w1 + b1, 0.0)
    h = jnp.maximum(h @ w2 + b2, 0.0)
    h = h @ w3 + b3                      # last layer of self.h: NO ReLU
    logits = h @ wo + bo
    return jax.nn.softmax(logits, axis=-1)


def init_linear(key, in_f, out_f):
    """Deterministic init mimicking torch.nn.Linear defaults (uniform +-1/sqrt(in))."""
    kw, kb = jax.random.split(key)
    bound = 1.0 / (in_f ** 0.5)
    w_t = jax.random.uniform(kw, (in_f, out_f), jnp.float32, -bound, bound)
    b = jax.random.uniform(kb, (out_f,), jnp.float32, -bound, bound).reshape(1, out_f)
    return w_t, b


if __name__ == "__main__":
    # dims = [z_dim, h_dim, n_class] with h_dim a list -> neurons = [32, 64, 32, 16]
    z_dim, h_dim, n_class = 32, [64, 32], 16
    neurons = [z_dim, *h_dim, n_class]
    batch = 8

    key = jax.random.PRNGKey(0)
    keys = jax.random.split(key, len(neurons) + 1)   # 3 hidden + 1 output + data

    params = []
    for i in range(1, len(neurons)):
        params.append(init_linear(keys[i - 1], neurons[i - 1], neurons[i]))
    # self.output = nn.Linear(dims[-1], n_class) == Linear(n_class, n_class)
    params.append(init_linear(keys[len(neurons) - 1], n_class, n_class))

    z = jax.random.normal(keys[-1], (batch, z_dim), jnp.float32)

    prepped = prepare_params(params)        # one-time prep, off the hot path
    out = classifier_forward(z, prepped)
    out = jax.block_until_ready(out)

    ref = _reference(z, params)

    assert out.shape == (batch, n_class)
    # softmax rows sum to 1 (exact divide -> only f32 rounding error)
    assert bool(jnp.allclose(jnp.sum(out, axis=-1), 1.0, atol=1e-4))
    # matches the f32 reference up to bf16 weight rounding
    err = float(jnp.max(jnp.abs(out - ref)))
    assert bool(jnp.allclose(out, ref, atol=2e-2)), err
    print("KERNEL_OK")
</pallas_src>

<mosaic_0001>
module attributes {stable_mosaic.version = 11 : i64} {
  func.func @_classifier_kernel(%arg0: i32, %arg1: memref<8x32xf32, #tpu.memory_space<vmem>>, %arg2: memref<32x128xbf16, #tpu.memory_space<vmem>>, %arg3: memref<1x128xf32, #tpu.memory_space<vmem>>, %arg4: memref<128x128xbf16, #tpu.memory_space<vmem>>, %arg5: memref<1x128xf32, #tpu.memory_space<vmem>>, %arg6: memref<128x128xbf16, #tpu.memory_space<vmem>>, %arg7: memref<1x128xf32, #tpu.memory_space<vmem>>, %arg8: memref<8x16xf32, #tpu.memory_space<vmem>>) attributes {dimension_semantics = [#tpu.dimension_semantics<parallel>], iteration_bounds = array<i64: 1>, scalar_prefetch = 0 : i64, scratch_operands = 0 : i64, tpu.core_type = #tpu.core_type<tc>, window_params = [{transform_indices = @transform_0, window_bounds = array<i64: 8, 32>}, {pipeline_mode = #tpu.pipeline_mode<synchronous>, transform_indices = @transform_1, window_bounds = array<i64: 32, 128>}, {pipeline_mode = #tpu.pipeline_mode<synchronous>, transform_indices = @transform_2, window_bounds = array<i64: 1, 128>}, {pipeline_mode = #tpu.pipeline_mode<synchronous>, transform_indices = @transform_3, window_bounds = array<i64: 128, 128>}, {pipeline_mode = #tpu.pipeline_mode<synchronous>, transform_indices = @transform_4, window_bounds = array<i64: 1, 128>}, {pipeline_mode = #tpu.pipeline_mode<synchronous>, transform_indices = @transform_5, window_bounds = array<i64: 128, 128>}, {pipeline_mode = #tpu.pipeline_mode<synchronous>, transform_indices = @transform_6, window_bounds = array<i64: 1, 128>}, {transform_indices = @transform_7, window_bounds = array<i64: 8, 16>}]} {
    %c0 = arith.constant 0 : index
    %c0_0 = arith.constant 0 : index
    %0 = vector.load %arg1[%c0, %c0_0] : memref<8x32xf32, #tpu.memory_space<vmem>>, vector<8x32xf32>
    %c0_1 = arith.constant 0 : index
    %c0_2 = arith.constant 0 : index
    %1 = vector.load %arg2[%c0_1, %c0_2] : memref<32x128xbf16, #tpu.memory_space<vmem>>, vector<32x128xbf16>
    %2 = arith.extf %1 : vector<32x128xbf16> to vector<32x128xf32>
    %c0_3 = arith.constant 0 : index
    %c0_4 = arith.constant 0 : index
    %3 = vector.load %arg4[%c0_3, %c0_4] : memref<128x128xbf16, #tpu.memory_space<vmem>>, vector<128x128xbf16>
    %4 = arith.extf %3 : vector<128x128xbf16> to vector<128x128xf32>
    %c0_5 = arith.constant 0 : index
    %c0_6 = arith.constant 0 : index
    %5 = vector.load %arg6[%c0_5, %c0_6] : memref<128x128xbf16, #tpu.memory_space<vmem>>, vector<128x128xbf16>
    %6 = arith.extf %5 : vector<128x128xbf16> to vector<128x128xf32>
    %cst = arith.constant dense<0.000000e+00> : vector<8x128xf32>
    %7 = tpu.matmul %0, %2, %cst {dimension_numbers = #tpu.dot_dimension_numbers<[1], [0], [0], [1], [0, 0, 1, 1], [], []>} : vector<8x32xf32>, vector<32x128xf32>, vector<8x128xf32> -> vector<8x128xf32>
    %c0_7 = arith.constant 0 : index
    %c0_8 = arith.constant 0 : index
    %8 = vector.load %arg3[%c0_7, %c0_8] : memref<1x128xf32, #tpu.memory_space<vmem>>, vector<1x128xf32>
    %9 = vector.broadcast %8 : vector<1x128xf32> to vector<8x128xf32>
    %10 = arith.addf %7, %9 : vector<8x128xf32>
    %cst_9 = arith.constant 0.000000e+00 : f32
    %11 = vector.broadcast %cst_9 : f32 to vector<8x128xf32>
    %12 = arith.maximumf %10, %11 : vector<8x128xf32>
    %cst_10 = arith.constant dense<0.000000e+00> : vector<8x128xf32>
    %13 = tpu.matmul %12, %4, %cst_10 {dimension_numbers = #tpu.dot_dimension_numbers<[1], [0], [0], [1], [0, 0, 1, 1], [], []>} : vector<8x128xf32>, vector<128x128xf32>, vector<8x128xf32> -> vector<8x128xf32>
    %c0_11 = arith.constant 0 : index
    %c0_12 = arith.constant 0 : index
    %14 = vector.load %arg5[%c0_11, %c0_12] : memref<1x128xf32, #tpu.memory_space<vmem>>, vector<1x128xf32>
    %15 = vector.broadcast %14 : vector<1x128xf32> to vector<8x128xf32>
    %16 = arith.addf %13, %15 : vector<8x128xf32>
    %cst_13 = arith.constant 0.000000e+00 : f32
    %17 = vector.broadcast %cst_13 : f32 to vector<8x128xf32>
    %18 = arith.maximumf %16, %17 : vector<8x128xf32>
    %cst_14 = arith.constant dense<0.000000e+00> : vector<8x128xf32>
    %19 = tpu.matmul %18, %6, %cst_14 {dimension_numbers = #tpu.dot_dimension_numbers<[1], [0], [0], [1], [0, 0, 1, 1], [], []>} : vector<8x128xf32>, vector<128x128xf32>, vector<8x128xf32> -> vector<8x128xf32>
    %c0_15 = arith.constant 0 : index
    %c0_16 = arith.constant 0 : index
    %20 = vector.load %arg7[%c0_15, %c0_16] : memref<1x128xf32, #tpu.memory_space<vmem>>, vector<1x128xf32>
    %21 = vector.broadcast %20 : vector<1x128xf32> to vector<8x128xf32>
    %22 = arith.addf %19, %21 : vector<8x128xf32>
    %cst_17 = arith.constant dense<0xFF800000> : vector<8xf32>
    %23 = vector.multi_reduction <maximumf>, %22, %cst_17 [1] : vector<8x128xf32> to vector<8xf32>
    %24 = vector.shape_cast %23 : vector<8xf32> to vector<8x1xf32>
    %25 = vector.broadcast %24 : vector<8x1xf32> to vector<8x128xf32>
    %26 = arith.subf %22, %25 : vector<8x128xf32>
    %27 = math.exp %26 : vector<8x128xf32>
    %cst_18 = arith.constant dense<0.000000e+00> : vector<8xf32>
    %28 = vector.multi_reduction <add>, %27, %cst_18 [1] : vector<8x128xf32> to vector<8xf32>
    %29 = vector.shape_cast %28 : vector<8xf32> to vector<8x1xf32>
    %30 = vector.broadcast %29 : vector<8x1xf32> to vector<8x128xf32>
    %31 = arith.divf %27, %30 : vector<8x128xf32>
    %32 = vector.extract_strided_slice %31 {offsets = [0, 0], sizes = [8, 16], strides = [1, 1]} : vector<8x128xf32> to vector<8x16xf32>
    %c0_19 = arith.constant 0 : index
    %c0_20 = arith.constant 0 : index
    %33 = vector.load %arg8[%c0_19, %c0_20] : memref<8x16xf32, #tpu.memory_space<vmem>>, vector<8x16xf32>
    tpu.vector_store %arg8[%c0_19, %c0_20], %32 {strides = array<i32>} : memref<8x16xf32, #tpu.memory_space<vmem>>, vector<8x16xf32>,
    return
  }
  func.func @transform_0(%arg0: i32) -> (i32, i32) {
    %c0_i32 = arith.constant 0 : i32
    %c0_i32_0 = arith.constant 0 : i32
    return %arg0, %c0_i32 : i32, i32
  }
  func.func @transform_1(%arg0: i32) -> (i32, i32) {
    %c0_i32 = arith.constant 0 : i32
    %c0_i32_0 = arith.constant 0 : i32
    %c0_i32_1 = arith.constant 0 : i32
    return %c0_i32, %c0_i32_0 : i32, i32
  }
  func.func @transform_2(%arg0: i32) -> (i32, i32) {
    %c0_i32 = arith.constant 0 : i32
    %c0_i32_0 = arith.constant 0 : i32
    %c0_i32_1 = arith.constant 0 : i32
    return %c0_i32, %c0_i32_0 : i32, i32
  }
  func.func @transform_3(%arg0: i32) -> (i32, i32) {
    %c0_i32 = arith.constant 0 : i32
    %c0_i32_0 = arith.constant 0 : i32
    %c0_i32_1 = arith.constant 0 : i32
    return %c0_i32, %c0_i32_0 : i32, i32
  }
  func.func @transform_4(%arg0: i32) -> (i32, i32) {
    %c0_i32 = arith.constant 0 : i32
    %c0_i32_0 = arith.constant 0 : i32
    %c0_i32_1 = arith.constant 0 : i32
    return %c0_i32, %c0_i32_0 : i32, i32
  }
  func.func @transform_5(%arg0: i32) -> (i32, i32) {
    %c0_i32 = arith.constant 0 : i32
    %c0_i32_0 = arith.constant 0 : i32
    %c0_i32_1 = arith.constant 0 : i32
    return %c0_i32, %c0_i32_0 : i32, i32
  }
  func.func @transform_6(%arg0: i32) -> (i32, i32) {
    %c0_i32 = arith.constant 0 : i32
    %c0_i32_0 = arith.constant 0 : i32
    %c0_i32_1 = arith.constant 0 : i32
    return %c0_i32, %c0_i32_0 : i32, i32
  }
  func.func @transform_7(%arg0: i32) -> (i32, i32) {
    %c0_i32 = arith.constant 0 : i32
    %c0_i32_0 = arith.constant 0 : i32
    return %arg0, %c0_i32 : i32, i32
  }
}

</mosaic_0001>

<bundles_post_ra>
// kernel: tpu_custom_call.1
= control target key start
LH: loop header
LB: loop body
LE: loop exit
PB: predicated region body
PF: predicated region fallthrough
CT: control target
= control target key end

     0   :  { %12 = vsyncpa [#allocation3], 0  ;;  %s946_s0 = inlined_call_operand.hbm [shape: f32[8,32], index: 0, kind: input, shape index: {}]   ;;  %s947_s1 = inlined_call_operand.hbm [shape: bf16[32,128], index: 1, kind: input, shape index: {}]   ;;  %s948_s2 = inlined_call_operand.vmem [shape: f32[1,128], index: 2, kind: input, shape index: {}]   ;;  %s949_s3 = inlined_call_operand.hbm [shape: bf16[128,128], index: 3, kind: input, shape index: {}]   ;;  %s950_s4 = inlined_call_operand.vmem [shape: f32[1,128], index: 4, kind: input, shape index: {}]   ;;  %s951_s5 = inlined_call_operand.hbm [shape: bf16[128,128], index: 5, kind: input, shape index: {}]   ;;  %s952_s6 = inlined_call_operand.vmem [shape: f32[1,128], index: 6, kind: input, shape index: {}]   ;;  %s953_s7 = inlined_call_operand.hbm [shape: f32[8,16], index: 7, kind: output, shape index: {}]  }
   0x1   :  { %13 = vsyncpa [#allocation6], 0 }
   0x2   :  { %14 = vsyncpa [#allocation9], 0 }
   0x3   :  { %15 = vsyncpa [#allocation4], 0  ;;  %s815_s24 = smov [#allocation5]   ;;  %s697_s28 = scalar_lea.hbm %s947_s1, 256 }
   0x4   :  { %s31_s25 = sshll.u32 %s815_s24, 4  ;;  %p698_p0 = scmp.ne.s32.totalorder %s947_s1, %s697_s28  ;;  %s32_s25 = int_to_ptr.vmem [resolvable:$true] %s31_s25 }
   0x5   :  { %p701_p1 = scmp.lt.u32.totalorder %s697_s28, %s947_s1 }
   0x7   :  { %p703_p2 = pnand %p701_p1, %p698_p0 }
   0x9   :  { %706 = shalt.err (!%p703_p2)
}
   0xa   :  { %s707_s10 = scalar_lea.vmem %s32_s25, 256  ;;  %p712_p4 = scmp.lt.s32.totalorder %s32_s25, %s32_s25 }
   0xb   :  { %p708_p3 = scmp.ne.s32.totalorder %s32_s25, %s707_s10  ;;  %p713_p5 = scmp.lt.s32.totalorder %s707_s10, %s707_s10 }
   0xd   :  { %p714_p6 = por %p713_p5, %p712_p4 }
   0xf   :  { %p715_p7 = pnand %p714_p6, %p708_p3 }
  0x11   :  { %718 = shalt.err (!%p715_p7)
}
  0x12   :  { %s816_s11 = smov 64   ;;  %s817_s12 = smov 4  }
  0x13   :  { %37 = dma.hbm_to_vmem [thread:$0]  %s947_s1, 256, %s32_s25, [#allocation6], %s816_s11, %s816_s11, %s817_s12  }
  0x14   :  { %s818_s15 = smov [#allocation2]   ;;  %s819_s17 = smov [#allocation7]  }
  0x15   :  { %s22_s16 = sshll.u32 %s818_s15, 4  ;;  %s45_s18 = sshll.u32 %s819_s17, 4  ;;  %s23_s16 = int_to_ptr.vmem [resolvable:$true] %s22_s16  ;;  %s46_s18 = int_to_ptr.vmem [resolvable:$true] %s45_s18 }
  0x16   :  { %s719_s21 = scalar_lea.hbm %s946_s0, 128 }
  0x17   :  { %p720_p8 = scmp.ne.s32.totalorder %s946_s0, %s719_s21  ;;  %p723_p9 = scmp.lt.u32.totalorder %s719_s21, %s946_s0 }
  0x19   :  { %p725_p10 = pnand %p723_p9, %p720_p8 }
  0x1b   :  { %728 = shalt.err (!%p725_p10)
}
  0x1c   :  { %s729_s1 = scalar_lea.vmem %s23_s16, 128  ;;  %p734_p12 = scmp.lt.s32.totalorder %s23_s16, %s23_s16 }
  0x1d   :  { %p730_p11 = scmp.ne.s32.totalorder %s23_s16, %s729_s1  ;;  %p735_p13 = scmp.lt.s32.totalorder %s729_s1, %s729_s1 }
  0x1f   :  { %p736_p0 = por %p735_p13, %p734_p12 }
  0x21   :  { %p737_p1 = pnand %p736_p0, %p730_p11 }
  0x23   :  { %740 = shalt.err (!%p737_p1)
}
  0x24   :  { %25 = dma.hbm_to_vmem [thread:$0]  %s946_s0, 128, %s23_s16, [#allocation3]  }
  0x25   :  { %s741_s30 = scalar_lea.hbm %s949_s3, 1024 }
  0x26   :  { %p742_p2 = scmp.ne.s32.totalorder %s949_s3, %s741_s30  ;;  %p745_p3 = scmp.lt.u32.totalorder %s741_s30, %s949_s3 }
  0x28   :  { %p747_p4 = pnand %p745_p3, %p742_p2 }
  0x2a   :  { %750 = shalt.err (!%p747_p4)
}
  0x2b   :  { %s751_s14 = scalar_lea.vmem %s46_s18, 1024  ;;  %p756_p6 = scmp.lt.s32.totalorder %s46_s18, %s46_s18 }
  0x2c   :  { %p752_p5 = scmp.ne.s32.totalorder %s46_s18, %s751_s14  ;;  %p757_p7 = scmp.lt.s32.totalorder %s751_s14, %s751_s14 }
  0x2e   :  { %p758_p8 = por %p757_p7, %p756_p6 }
  0x30   :  { %p759_p9 = pnand %p758_p8, %p752_p5 }
  0x32   :  { %762 = shalt.err (!%p759_p9)
}
  0x33   :  { %51 = dma.hbm_to_vmem [thread:$0]  %s949_s3, 1024, %s46_s18, [#allocation6], %s816_s11, %s816_s11, %s817_s12  }
  0x34   :  { %s820_s16 = smov [#allocation8]   ;;  %s763_s21 = scalar_lea.hbm %s951_s5, 1024 }
  0x35   :  { %s59_s17 = sshll.u32 %s820_s16, 4  ;;  %p764_p10 = scmp.ne.s32.totalorder %s951_s5, %s763_s21  ;;  %s60_s17 = int_to_ptr.vmem [resolvable:$true] %s59_s17 }
  0x36   :  { %p767_p11 = scmp.lt.u32.totalorder %s763_s21, %s951_s5 }
  0x38   :  { %p769_p12 = pnand %p767_p11, %p764_p10 }
  0x3a   :  { %772 = shalt.err (!%p769_p12)
}
  0x3b   :  { %s773_s1 = scalar_lea.vmem %s60_s17, 1024  ;;  %p778_p0 = scmp.lt.s32.totalorder %s60_s17, %s60_s17 }
  0x3c   :  { %p774_p13 = scmp.ne.s32.totalorder %s60_s17, %s773_s1  ;;  %p779_p1 = scmp.lt.s32.totalorder %s773_s1, %s773_s1 }
  0x3e   :  { %p780_p2 = por %p779_p1, %p778_p0 }
  0x40   :  { %p781_p3 = pnand %p780_p2, %p774_p13 }
  0x42   :  { %784 = shalt.err (!%p781_p3)
}
  0x43   :  { %65 = dma.hbm_to_vmem [thread:$0]  %s951_s5, 1024, %s60_s17, [#allocation9], %s816_s11, %s816_s11, %s817_s12  }
  0x44   :  { %807 = dma.done.wait [#allocation3], 128  }
  0x45   :  { %808 = vsyncadd [#allocation3], 4294967168 }
  0x46   :  { %809 = dma.done.wait [#allocation6], 1280  }
  0x47   :  { %810 = vsyncadd [#allocation6], 4294966016 }
  0x48   :  { %811 = dma.done.wait [#allocation9], 1024  }
  0x49   :  { %812 = vsyncadd [#allocation9], 4294966272  ;;  %v821_v0 = vmov 0.0|0.0   ;;  %vm822_vm0 = vmmov 0   ;;  %v823_v1 = vmov 0.0   ;;  %v423_v2 = vld [vmem:[#allocation5] sm:$0xff]  }
  0x4a   :  { %629 = vmatprep.subr.bf16.mxu0 %v821_v0  ;;  %556 = vmatprep.mubr.msk.f32.mxu0 %vm822_vm0, %v823_v1  ;;  %v431_v3 = vld [vmem:[#allocation7] sm:$0xff]   ;;  %v494_v4 = vld [vmem:[#allocation5 + $0x8] sm:$0xff]   ;;  %v495_v5 = vld [vmem:[#allocation7 + $0x8] sm:$0xff]   ;;  %vm160_vm1 = vcmask 261120   ;;  %vm399_vm2 = vcmask 130048  }
  0x4b   :  { %635 = vmatprep.subr.bf16.mxu1 %v821_v0  ;;  %591 = vmatprep.mubr.msk.f32.mxu1 %vm822_vm0, %v823_v1  ;;  %v80_v6 = vld [vmem:[#allocation2] sm:$0xff]  ;;  %v496_v7 = vld [vmem:[#allocation7 + $0x10] sm:$0xff]   ;;  %v497_v8 = vld [vmem:[#allocation7 + $0x18] sm:$0xff]  }
  0x4c   :  { %631 = vmatpush3.bf16.msra.mxu0 %v423_v2  ;;  %637 = vmatpush3.bf16.msra.mxu1 %v431_v3  ;;  %v498_v9 = vld [vmem:[#allocation7 + $0x20] sm:$0xff]   ;;  %v499_v10 = vld [vmem:[#allocation7 + $0x28] sm:$0xff]   ;;  %v500_v11 = vld [vmem:[#allocation7 + $0x30] sm:$0xff]  }
  0x4d   :  { %632 = vmatprep.subr.bf16.mxu0 %v821_v0  ;;  %638 = vmatprep.subr.bf16.mxu1 %v821_v0  ;;  %v501_v12 = vld [vmem:[#allocation7 + $0x38] sm:$0xff]   ;;  %v463_v13 = vld [vmem:[#allocation8] sm:$0xff]   ;;  %v502_v14 = vld [vmem:[#allocation8 + $0x8] sm:$0xff]  }
  0x4e   :  { %v503_v15 = vld [vmem:[#allocation8 + $0x10] sm:$0xff]   ;;  %v504_v16 = vld [vmem:[#allocation8 + $0x18] sm:$0xff]   ;;  %v505_v17 = vld [vmem:[#allocation8 + $0x20] sm:$0xff]  }
  0x4f   :  { %v506_v18 = vld [vmem:[#allocation8 + $0x28] sm:$0xff]   ;;  %v507_v19 = vld [vmem:[#allocation8 + $0x30] sm:$0xff]   ;;  %v508_v25 = vld [vmem:[#allocation8 + $0x38] sm:$0xff]  }
  0x50   :  { %634 = vmatpush3.bf16.msra.mxu0 %v494_v4  ;;  %640 = vmatpush3.bf16.msra.mxu1 %v495_v5  ;;  %v418_v20 = vld [vmem:[%s948_s2] ss:$0 sm:$0xff]  ;;  %s824_s2 = smov [#allocation10]  }
  0x51   :  { %659 = vmatprep.subr.bf16.mxu0 %v821_v0  ;;  %641 = vmatprep.subr.bf16.mxu1 %v821_v0  ;;  %v420_v26 = vld [vmem:[%s950_s4] ss:$0 sm:$0xff]  ;;  %s407_s4 = sshll.u32 %s824_s2, 4  ;;  %s408_s4 = int_to_ptr.vmem [resolvable:$true] %s407_s4 }
  0x52   :  { %v421_v31 = vld [vmem:[%s952_s6] ss:$0 sm:$0xff]  ;;  %s785_s6 = scalar_lea.vmem %s408_s4, 128  ;;  %p790_p5 = scmp.lt.s32.totalorder %s408_s4, %s408_s4 }
  0x53   :  { %557 = vmatmul.mubr.msk.f32.vlgmr.msra.gmra.mrb[0].mxu0 %vm160_vm1, %v80_v6  ;;  %p786_p4 = scmp.ne.s32.totalorder %s408_s4, %s785_s6  ;;  %p791_p6 = scmp.lt.s32.totalorder %s785_s6, %s785_s6 }
  0x54   :  { %626 = vmatprep.mubr.msk.f32.mxu0 %vm822_vm0, %v823_v1  ;;  %643 = vmatpush3.bf16.msra.mxu1 %v496_v7 }
  0x55   :  { %644 = vmatprep.subr.bf16.mxu1 %v821_v0  ;;  %661 = vmatpush3.bf16.msra.mxu0 %v463_v13  ;;  %p792_p7 = por %p791_p6, %p790_p5 }
  0x56   :  { %662 = vmatprep.subr.bf16.mxu0 %v821_v0 }
  0x57   :  { %p793_p8 = pnand %p792_p7, %p786_p4 }
  0x58   :  { %646 = vmatpush3.bf16.msra.mxu1 %v497_v8 }
  0x59   :  { %647 = vmatprep.subr.bf16.mxu1 %v821_v0  ;;  %664 = vmatpush3.bf16.msra.mxu0 %v502_v14 }
  0x5a   :  { %665 = vmatprep.subr.bf16.mxu0 %v821_v0 }
  0x5c   :  { %649 = vmatpush3.bf16.msra.mxu1 %v498_v9 }
  0x5d   :  { %650 = vmatprep.subr.bf16.mxu1 %v821_v0  ;;  %667 = vmatpush3.bf16.msra.mxu0 %v503_v15 }
  0x5e   :  { %668 = vmatprep.subr.bf16.mxu0 %v821_v0 }
  0x60   :  { %652 = vmatpush3.bf16.msra.mxu1 %v499_v10 }
  0x61   :  { %653 = vmatprep.subr.bf16.mxu1 %v821_v0  ;;  %670 = vmatpush3.bf16.msra.mxu0 %v504_v16 }
  0x62   :  { %671 = vmatprep.subr.bf16.mxu0 %v821_v0 }
  0x64   :  { %655 = vmatpush3.bf16.msra.mxu1 %v500_v11 }
  0x65   :  { %656 = vmatprep.subr.bf16.mxu1 %v821_v0  ;;  %673 = vmatpush3.bf16.msra.mxu0 %v505_v17 }
  0x66   :  { %674 = vmatprep.subr.bf16.mxu0 %v821_v0 }
  0x68   :  { %658 = vmatpush3.bf16.msra.mxu1 %v501_v12 }
  0x69   :  { %676 = vmatpush3.bf16.msra.mxu0 %v506_v18 }
  0x6a   :  { %677 = vmatprep.subr.bf16.mxu0 %v821_v0 }
  0x6d   :  { %679 = vmatpush3.bf16.msra.mxu0 %v507_v19 }
  0x6e   :  { %680 = vmatprep.subr.bf16.mxu0 %v821_v0 }
  0x71   :  { %682 = vmatpush3.bf16.msra.mxu0 %v508_v25 }
 0x126   :  { %v230_v21 = vpop.f32.mrb[0].mxu0 }
 0x127   :  { %v231_v22 = vadd.f32 %v418_v20, %v230_v21  ;;  %v558_v23 = vpop.f32.mrb[1].mxu0 }
 0x129   :  { %v234_v24 = vmax.f32 %v231_v22, 0.0 }
 0x12b   :  { %592 = vmatmul.mubr.f32.vlgmr.msra.gmra.mrb[0].mxu1 %v234_v24 }
 0x1fe   :  { %v308_v27 = vpop.f32.mrb[0].mxu1 }
 0x1ff   :  { %v309_v28 = vadd.f32 %v420_v26, %v308_v27  ;;  %v593_v29 = vpop.f32.mrb[1].mxu1 }
 0x201   :  { %v312_v30 = vmax.f32 %v309_v28, 0.0 }
 0x203   :  { %627 = vmatmul.mubr.f32.vlgmr.msra.gmra.mrb[2].mxu0 %v312_v30 }
 0x2d6   :  { %v386_v32 = vpop.f32.mrb[2].mxu0 }
 0x2d7   :  { %v387_v33 = vadd.f32 %v421_v31, %v386_v32  ;;  %v628_v34 = vpop.f32.mrb[3].mxu0 }
 0x2d9   :  { %390 = vmax.xlane.f32.xlu0 %v387_v33 }
 0x366   :  { %v391_v35 = vpop.xlane.xlu0 %390 }
 0x367   :  { %v392_v36 = vsub.f32 %v387_v33, %v391_v35 }
 0x369   :  { %v393_v37 = vmul.f32 1.442695, %v392_v36 }
 0x36b   :  { %693 = vpow2.f32 %v393_v37 }
 0x375   :  { %v694_v38 = vpop.eup %693 }
 0x376   :  { %395 = vadd.xlane.f32.xlu0 %v694_v38 }
 0x403   :  { %v396_v39 = vpop.xlane.xlu0 %395 }
 0x404   :  { %695 = vrcp.f32 %v396_v39 }
 0x40e   :  { %v696_v40 = vpop.eup %695 }
 0x40f   :  { %v398_v41 = vmul.f32 %v696_v40, %v694_v38 }
 0x411   :  { %400 = vst.msk [vmem:[#allocation10] sm:$0xff] %vm399_vm2, %v398_v41 }
 0x412   :  { %796 = shalt.err (!%p793_p8)
}
 0x413   :  { %s797_s8 = scalar_lea.hbm %s953_s7, 128 }
 0x414   :  { %p798_p9 = scmp.ne.s32.totalorder %s953_s7, %s797_s8  ;;  %p801_p10 = scmp.lt.u32.totalorder %s797_s8, %s953_s7 }
 0x416   :  { %p803_p11 = pnand %p801_p10, %p798_p9 }
 0x418   :  { %806 = shalt.err (!%p803_p11)
}
 0x419   :  { %410 = dma.vmem_to_hbm [thread:$0]  %s408_s4, 128, %s953_s7, [#allocation4]  }
 0x41a   :  { %813 = dma.done.wait [#allocation4], 128  }
 0x41b   :  { %814 = vsyncadd [#allocation4], 4294967168 }
 0x41c   :  { %414 = vsyncpa [#allocation3], 1 }
 0x41d   :  { %415 = vsyncpa [#allocation6], 1 }
 0x41e   :  { %416 = vsyncpa [#allocation9], 1 }
 0x41f   :  { %417 = vsyncpa [#allocation4], 1 }

</bundles_post_ra>
